<compile_context>
chip_gen: v7x
topology: tpu7x:2x2x1
jax: 0.10.0
libtpu: 0.0.40
codegen_flags: <defaults>
</compile_context>

<pallas_src>
import functools

import jax
import jax.numpy as jnp
from jax.experimental import pallas as pl
from jax.experimental.pallas import tpu as pltpu


def _round_up(x, m):
    return ((x + m - 1) // m) * m


def _vmem_capacity_bytes():
    try:
        return int(pltpu.get_tpu_info().vmem_capacity_bytes)
    except Exception:
        return 64 * 1024 * 1024  # conservative fallback (v7x per-core VMEM)


def _layernorm_f32(s, gamma, beta, eps):
    """LayerNorm over the last axis; `s`, `gamma`, `beta` are already f32."""
    mean = jnp.mean(s, axis=-1, keepdims=True)
    c = s - mean
    var = jnp.mean(c * c, axis=-1, keepdims=True)
    inv = jax.lax.rsqrt(var + eps)
    return c * inv * gamma + beta


def _residual_ln_kernel(x_ref, fn_ref, g_ref, b_ref, o_ref, *, eps):
    # in_ch == out_ch path:  y = LN(x + fn(x))
    s = x_ref[...].astype(jnp.float32) + fn_ref[...].astype(jnp.float32)
    o_ref[...] = _layernorm_f32(s, g_ref[...], b_ref[...], eps).astype(o_ref.dtype)


def _resample_residual_ln_kernel(
    x_ref, fn_ref, w_ref, bias_ref, g_ref, b_ref, o_ref, *, eps, matmul_dtype
):
    # in_ch != out_ch path:  y = LN(Linear(x) + fn(x))
    # bf16 x bf16 -> f32 accumulation: MXU-native on v5e/v6e/v7x.
    h = jnp.dot(
        x_ref[...].astype(matmul_dtype),
        w_ref[...],
        preferred_element_type=jnp.float32,
    )
    s = h + bias_ref[...] + fn_ref[...].astype(jnp.float32)
    o_ref[...] = _layernorm_f32(s, g_ref[...], b_ref[...], eps).astype(o_ref.dtype)


def _pick_row_tile(M, in_ch, out_ch, x_bytes, fn_bytes, out_bytes, const_bytes,
                   sub, max_tm, vmem_bytes):
    """Largest row tile that fits the generation's VMEM, with >=2 blocks for
    megacore when the problem allows it."""
    # Per-row VMEM: double-buffered x / fn / out streams + ~4 f32 temporaries
    # of the widest feature dim (matmul result / LN intermediates).
    per_row = (2 * in_ch * x_bytes + 2 * out_ch * fn_bytes
               + 2 * out_ch * out_bytes + 4 * 4 * max(in_ch, out_ch))
    budget = max(int(0.55 * vmem_bytes) - const_bytes, per_row * sub)
    tm = min(budget // per_row, max_tm)
    if M > sub:
        # at least two row blocks so both v7x TensorCores get rows
        tm = min(tm, _round_up(pl.cdiv(M, 2), sub))
    tm = min(tm, _round_up(M, sub))
    return max(sub, (tm // sub) * sub)


def residual_forward(x, fn_out, gamma, beta, w_r=None, b_r=None, *,
                     eps=1e-5, max_tm=1024, matmul_dtype=jnp.bfloat16):
    """Fused Residual forward.

    x:      (batch, seq, in_ch)     -- streamed in its model dtype (no upcast)
    fn_out: (batch, seq, out_ch)    -- output of self.fn(x), computed outside
    gamma, beta: (out_ch,)          -- LayerNorm affine params
    w_r:    (in_ch, out_ch) or None -- resample weight (transposed vs PyTorch)
    b_r:    (out_ch,)       or None -- resample bias
    """
    # TODO(synk): self.fn is an arbitrary wrapped module; it is evaluated
    # outside the kernel and its result is passed in as `fn_out`.
    batch, seq, in_ch = x.shape
    out_ch = fn_out.shape[-1]
    M = batch * seq
    out_dtype = x.dtype

    # Free reshapes (merge leading dims only) — no extra HBM traffic.
    x2 = x.reshape(M, in_ch)
    fn2 = fn_out.reshape(M, out_ch)

    # Tiny constants pre-cast to f32 once in the wrapper (no per-step casts).
    gamma2 = gamma.astype(jnp.float32).reshape(1, out_ch)
    beta2 = beta.astype(jnp.float32).reshape(1, out_ch)

    x_bytes = jnp.dtype(x.dtype).itemsize
    fn_bytes = jnp.dtype(fn_out.dtype).itemsize
    out_bytes = jnp.dtype(out_dtype).itemsize
    min_bytes = min(x_bytes, fn_bytes, out_bytes)
    sub = 8 if min_bytes >= 4 else (16 if min_bytes == 2 else 32)

    const_bytes = 0
    if w_r is not None:
        const_bytes = in_ch * out_ch * jnp.dtype(matmul_dtype).itemsize

    vmem_cap = _vmem_capacity_bytes()
    tm_eff = _pick_row_tile(M, in_ch, out_ch, x_bytes, fn_bytes, out_bytes,
                            const_bytes, sub, max_tm, vmem_cap)
    grid_m = pl.cdiv(M, tm_eff)            # ragged last tile: masked store
    vmem_limit = int(min(0.75 * vmem_cap, 100 * 1024 * 1024))

    # Constants: whole array resident in VMEM, loaded once.
    const_spec = pl.BlockSpec(memory_space=pltpu.MemorySpace.VMEM)
    row_spec_in = pl.BlockSpec((tm_eff, in_ch), lambda i: (i, 0))
    row_spec_out = pl.BlockSpec((tm_eff, out_ch), lambda i: (i, 0))

    if w_r is None:
        assert in_ch == out_ch, "no-resample path requires in_ch == out_ch"
        kernel = functools.partial(_residual_ln_kernel, eps=float(eps))
        in_specs = [row_spec_in, row_spec_out, const_spec, const_spec]
        args = (x2, fn2, gamma2, beta2)
    else:
        w_mx = w_r.astype(matmul_dtype)                       # MXU-native
        b_r2 = b_r.astype(jnp.float32).reshape(1, out_ch)
        kernel = functools.partial(
            _resample_residual_ln_kernel, eps=float(eps), matmul_dtype=matmul_dtype
        )
        in_specs = [
            row_spec_in,   # x rows
            row_spec_out,  # fn(x) rows
            const_spec,    # W_resample (in_ch, out_ch) in matmul_dtype
            const_spec,    # b_resample (1, out_ch) f32
            const_spec,    # gamma      (1, out_ch) f32
            const_spec,    # beta       (1, out_ch) f32
        ]
        args = (x2, fn2, w_mx, b_r2, gamma2, beta2)

    out = pl.pallas_call(
        kernel,
        out_shape=jax.ShapeDtypeStruct((M, out_ch), out_dtype),
        grid_spec=pltpu.PrefetchScalarGridSpec(
            num_scalar_prefetch=0,
            grid=(grid_m,),
            in_specs=in_specs,
            out_specs=row_spec_out,
        ),
        compiler_params=pltpu.CompilerParams(
            dimension_semantics=("parallel",),   # v7x: both TCs share the rows
            vmem_limit_bytes=vmem_limit,
        ),
    )(*args)

    return out.reshape(batch, seq, out_ch)


def _ln_ref(s, gamma, beta, eps=1e-5):
    mean = s.mean(axis=-1, keepdims=True)
    var = ((s - mean) ** 2).mean(axis=-1, keepdims=True)
    return (s - mean) * jax.lax.rsqrt(var + eps) * gamma + beta


if __name__ == "__main__":
    key = jax.random.PRNGKey(0)
    ks = jax.random.split(key, 10)

    # ---- Path 1: resample Linear (in_ch != out_ch), fn output supplied.
    batch, seq, in_ch, out_ch = 2, 8, 32, 64
    x = jax.random.normal(ks[0], (batch, seq, in_ch), jnp.float32)
    fn_out = jax.random.normal(ks[1], (batch, seq, out_ch), jnp.float32)
    lim = 1.0 / jnp.sqrt(in_ch)
    w_r = jax.random.uniform(ks[2], (in_ch, out_ch), jnp.float32, -lim, lim)
    b_r = jax.random.uniform(ks[3], (out_ch,), jnp.float32, -lim, lim)
    gamma = jax.random.normal(ks[4], (out_ch,), jnp.float32)
    beta = jax.random.normal(ks[5], (out_ch,), jnp.float32)

    y1 = jax.block_until_ready(residual_forward(x, fn_out, gamma, beta, w_r, b_r))
    h1 = jnp.dot(x.astype(jnp.bfloat16), w_r.astype(jnp.bfloat16),
                 preferred_element_type=jnp.float32)
    ref1 = _ln_ref(h1 + b_r + fn_out, gamma, beta)
    assert y1.shape == (batch, seq, out_ch)
    assert jnp.allclose(y1, ref1, atol=2e-3, rtol=2e-3), "resample path mismatch"

    # ---- Path 2: no resample (in_ch == out_ch); fn = identity in this demo.
    x2 = jax.random.normal(ks[6], (batch, seq, in_ch), jnp.float32)
    gamma2 = jax.random.normal(ks[7], (in_ch,), jnp.float32)
    beta2 = jnp.zeros((in_ch,), jnp.float32)
    y2 = jax.block_until_ready(residual_forward(x2, x2, gamma2, beta2))
    ref2 = _ln_ref(x2 + x2, gamma2, beta2)
    assert y2.shape == (batch, seq, in_ch)
    assert jnp.allclose(y2, ref2, atol=1e-4, rtol=1e-4), "identity path mismatch"

    # ---- Path 3: ragged rows (M=15 not a multiple of the row tile), resample.
    b3, s3 = 3, 5
    x3 = jax.random.normal(ks[8], (b3, s3, in_ch), jnp.float32)
    fn3 = jax.random.normal(ks[9], (b3, s3, out_ch), jnp.float32)
    y3 = jax.block_until_ready(residual_forward(x3, fn3, gamma, beta, w_r, b_r))
    h3 = jnp.dot(x3.astype(jnp.bfloat16), w_r.astype(jnp.bfloat16),
                 preferred_element_type=jnp.float32)
    ref3 = _ln_ref(h3 + b_r + fn3, gamma, beta)
    assert y3.shape == (b3, s3, out_ch)
    assert jnp.allclose(y3, ref3, atol=2e-3, rtol=2e-3), "ragged-tile path mismatch"

    print("KERNEL_OK")
</pallas_src>

<mosaic_0001>
module attributes {stable_mosaic.version = 11 : i64} {
  func.func @_resample_residual_ln_kernel(%arg0: i32, %arg1: memref<8x32xf32, #tpu.memory_space<vmem>>, %arg2: memref<8x64xf32, #tpu.memory_space<vmem>>, %arg3: memref<32x64xbf16, #tpu.memory_space<vmem>>, %arg4: memref<1x64xf32, #tpu.memory_space<vmem>>, %arg5: memref<1x64xf32, #tpu.memory_space<vmem>>, %arg6: memref<1x64xf32, #tpu.memory_space<vmem>>, %arg7: memref<8x64xf32, #tpu.memory_space<vmem>>) attributes {dimension_semantics = [#tpu.dimension_semantics<parallel>], iteration_bounds = array<i64: 2>, scalar_prefetch = 0 : i64, scratch_operands = 0 : i64, tpu.core_type = #tpu.core_type<tc>, window_params = [{transform_indices = @transform_0, window_bounds = array<i64: 8, 32>}, {transform_indices = @transform_1, window_bounds = array<i64: 8, 64>}, {pipeline_mode = #tpu.pipeline_mode<synchronous>, transform_indices = @transform_2, window_bounds = array<i64: 32, 64>}, {pipeline_mode = #tpu.pipeline_mode<synchronous>, transform_indices = @transform_3, window_bounds = array<i64: 1, 64>}, {pipeline_mode = #tpu.pipeline_mode<synchronous>, transform_indices = @transform_4, window_bounds = array<i64: 1, 64>}, {pipeline_mode = #tpu.pipeline_mode<synchronous>, transform_indices = @transform_5, window_bounds = array<i64: 1, 64>}, {transform_indices = @transform_6, window_bounds = array<i64: 8, 64>}]} {
    %c0 = arith.constant 0 : index
    %c0_0 = arith.constant 0 : index
    %0 = vector.load %arg1[%c0, %c0_0] : memref<8x32xf32, #tpu.memory_space<vmem>>, vector<8x32xf32>
    %1 = arith.truncf %0 : vector<8x32xf32> to vector<8x32xbf16>
    %c0_1 = arith.constant 0 : index
    %c0_2 = arith.constant 0 : index
    %2 = vector.load %arg3[%c0_1, %c0_2] : memref<32x64xbf16, #tpu.memory_space<vmem>>, vector<32x64xbf16>
    %cst = arith.constant dense<0.000000e+00> : vector<8x64xf32>
    %3 = tpu.matmul %1, %2, %cst {dimension_numbers = #tpu.dot_dimension_numbers<[1], [0], [0], [1], [0, 0, 1, 1], [], []>} : vector<8x32xbf16>, vector<32x64xbf16>, vector<8x64xf32> -> vector<8x64xf32>
    %c0_3 = arith.constant 0 : index
    %c0_4 = arith.constant 0 : index
    %4 = vector.load %arg4[%c0_3, %c0_4] : memref<1x64xf32, #tpu.memory_space<vmem>>, vector<1x64xf32>
    %5 = vector.broadcast %4 : vector<1x64xf32> to vector<8x64xf32>
    %6 = arith.addf %3, %5 : vector<8x64xf32>
    %c0_5 = arith.constant 0 : index
    %c0_6 = arith.constant 0 : index
    %7 = vector.load %arg2[%c0_5, %c0_6] : memref<8x64xf32, #tpu.memory_space<vmem>>, vector<8x64xf32>
    %8 = arith.addf %6, %7 : vector<8x64xf32>
    %c0_7 = arith.constant 0 : index
    %c0_8 = arith.constant 0 : index
    %9 = vector.load %arg5[%c0_7, %c0_8] : memref<1x64xf32, #tpu.memory_space<vmem>>, vector<1x64xf32>
    %c0_9 = arith.constant 0 : index
    %c0_10 = arith.constant 0 : index
    %10 = vector.load %arg6[%c0_9, %c0_10] : memref<1x64xf32, #tpu.memory_space<vmem>>, vector<1x64xf32>
    %cst_11 = arith.constant dense<0.000000e+00> : vector<8xf32>
    %11 = vector.multi_reduction <add>, %8, %cst_11 [1] : vector<8x64xf32> to vector<8xf32>
    %12 = vector.shape_cast %11 : vector<8xf32> to vector<8x1xf32>
    %cst_12 = arith.constant 6.400000e+01 : f32
    %13 = vector.broadcast %cst_12 : f32 to vector<8x1xf32>
    %14 = arith.divf %12, %13 : vector<8x1xf32>
    %15 = vector.broadcast %14 : vector<8x1xf32> to vector<8x64xf32>
    %16 = arith.subf %8, %15 : vector<8x64xf32>
    %17 = arith.mulf %16, %16 : vector<8x64xf32>
    %cst_13 = arith.constant dense<0.000000e+00> : vector<8xf32>
    %18 = vector.multi_reduction <add>, %17, %cst_13 [1] : vector<8x64xf32> to vector<8xf32>
    %19 = vector.shape_cast %18 : vector<8xf32> to vector<8x1xf32>
    %cst_14 = arith.constant 6.400000e+01 : f32
    %20 = vector.broadcast %cst_14 : f32 to vector<8x1xf32>
    %21 = arith.divf %19, %20 : vector<8x1xf32>
    %cst_15 = arith.constant 9.99999974E-6 : f32
    %22 = vector.broadcast %cst_15 : f32 to vector<8x1xf32>
    %23 = arith.addf %21, %22 : vector<8x1xf32>
    %24 = math.rsqrt %23 : vector<8x1xf32>
    %25 = vector.broadcast %24 : vector<8x1xf32> to vector<8x64xf32>
    %26 = arith.mulf %16, %25 : vector<8x64xf32>
    %27 = vector.broadcast %9 : vector<1x64xf32> to vector<8x64xf32>
    %28 = arith.mulf %26, %27 : vector<8x64xf32>
    %29 = vector.broadcast %10 : vector<1x64xf32> to vector<8x64xf32>
    %30 = arith.addf %28, %29 : vector<8x64xf32>
    %c0_16 = arith.constant 0 : index
    %c0_17 = arith.constant 0 : index
    %31 = vector.load %arg7[%c0_16, %c0_17] : memref<8x64xf32, #tpu.memory_space<vmem>>, vector<8x64xf32>
    tpu.vector_store %arg7[%c0_16, %c0_17], %30 {strides = array<i32>} : memref<8x64xf32, #tpu.memory_space<vmem>>, vector<8x64xf32>,
    return
  }
  func.func @transform_0(%arg0: i32) -> (i32, i32) {
    %c0_i32 = arith.constant 0 : i32
    %c0_i32_0 = arith.constant 0 : i32
    return %arg0, %c0_i32 : i32, i32
  }
  func.func @transform_1(%arg0: i32) -> (i32, i32) {
    %c0_i32 = arith.constant 0 : i32
    %c0_i32_0 = arith.constant 0 : i32
    return %arg0, %c0_i32 : i32, i32
  }
  func.func @transform_2(%arg0: i32) -> (i32, i32) {
    %c0_i32 = arith.constant 0 : i32
    %c0_i32_0 = arith.constant 0 : i32
    %c0_i32_1 = arith.constant 0 : i32
    return %c0_i32, %c0_i32_0 : i32, i32
  }
  func.func @transform_3(%arg0: i32) -> (i32, i32) {
    %c0_i32 = arith.constant 0 : i32
    %c0_i32_0 = arith.constant 0 : i32
    %c0_i32_1 = arith.constant 0 : i32
    return %c0_i32, %c0_i32_0 : i32, i32
  }
  func.func @transform_4(%arg0: i32) -> (i32, i32) {
    %c0_i32 = arith.constant 0 : i32
    %c0_i32_0 = arith.constant 0 : i32
    %c0_i32_1 = arith.constant 0 : i32
    return %c0_i32, %c0_i32_0 : i32, i32
  }
  func.func @transform_5(%arg0: i32) -> (i32, i32) {
    %c0_i32 = arith.constant 0 : i32
    %c0_i32_0 = arith.constant 0 : i32
    %c0_i32_1 = arith.constant 0 : i32
    return %c0_i32, %c0_i32_0 : i32, i32
  }
  func.func @transform_6(%arg0: i32) -> (i32, i32) {
    %c0_i32 = arith.constant 0 : i32
    %c0_i32_0 = arith.constant 0 : i32
    return %arg0, %c0_i32 : i32, i32
  }
}

</mosaic_0001>

<bundles_post_ra>
// kernel: tpu_custom_call.1
= control target key start
LH: loop header
LB: loop body
LE: loop exit
PB: predicated region body
PF: predicated region fallthrough
CT: control target
= control target key end

     0   :  { %s1096_s0 = inlined_call_operand.hbm [shape: f32[16,32], index: 0, kind: input, shape index: {}]   ;;  %s1097_s1 = inlined_call_operand.hbm [shape: f32[16,64], index: 1, kind: input, shape index: {}]   ;;  %s1098_s2 = inlined_call_operand.hbm [shape: bf16[32,64], index: 2, kind: input, shape index: {}]   ;;  %s1099_s3 = inlined_call_operand.vmem [shape: f32[1,64], index: 3, kind: input, shape index: {}]   ;;  %s1100_s4 = inlined_call_operand.vmem [shape: f32[1,64], index: 4, kind: input, shape index: {}]   ;;  %s1101_s5 = inlined_call_operand.vmem [shape: f32[1,64], index: 5, kind: input, shape index: {}]   ;;  %s1102_s6 = inlined_call_operand.hbm [shape: f32[16,64], index: 6, kind: output, shape index: {}]  }
   0x1   :  { %1108 = sst [smem:[#allocation15_spill]] %s1098_s2 }
   0x2   :  { %11 = vsyncpa [#allocation3], 0 }
   0x3   :  { %13 = vsyncpa [#allocation3 + $0x1], 0 }
   0x4   :  { %14 = vsyncpa [#allocation6], 0 }
   0x5   :  { %16 = vsyncpa [#allocation6 + $0x1], 0 }
   0x6   :  { %17 = vsyncpa [#allocation4], 0 }
   0x7   :  { %19 = vsyncpa [#allocation4 + $0x1], 0  ;;  %s849_s21 = smov 0   ;;  %s851_s22 = smov 0  }
   0x8   :  { %s853_s23 = smov 0   ;;  %s855_s24 = smov 0  }
   0x9 LB: > { %1109 = sst [smem:[#allocation13_spill]] %s800_s23  ;;  %s870_s25 = sadd.s32 4294967295, %s804_s24   ;;  %s804_s24 = sphi %s855_s24, %s1131_s24   ;;  %s800_s23 = sphi %s853_s23, %s1130_s23   ;;  %s796_s22 = sphi %s851_s22, %s1129_s22   ;;  %s792_s21 = sphi %s849_s21, %s1128_s21  }
   0xa   : > { %s538_s26 = sadd.s32 4294967294, %s804_s24   ;;  %p45_p0 = scmp.ne.s32.totalorder %s796_s22, %s792_s21 }
   0xb   : > { %p1103_p1 = scmp.eq.s32.totalorder %s870_s25, 0  ;;  %p185_p3 = scmp.eq.s32.totalorder %s538_s26, 1 }
   0xc   : > { %p539_p5 = scmp.ge.s32.totalorder %s804_s24, 1  ;;  %p192_p7 = scmp.lt.s32.totalorder %s804_s24, 3 }
   0xd   : > { %p879_p4 = por %p1103_p1, %p45_p0  ;;  %p884_p6 = por %p185_p3, %p45_p0 }
   0xe   : > { %p889_p8 = pnand %p539_p5, %p192_p7  ;;  %s806_s30 = smov [#allocation7]  }
   0xf   : > { %s1110_s27 = scalar_select %p879_p4, 1, 0 }
  0x10   : > { %s1111_s28 = scalar_select %p884_p6, 1, 0 }
  0x11   : > { %s1112_s29 = scalar_select %p889_p8, 1, 0 }
  0x12   : > { %s204_s7 = sshll.u32 %s806_s30, 4  ;;  %p582_p9 = pneg %p889_p8  ;;  %s893_s7 = int_to_ptr.vmem [resolvable:$true] %s204_s7 }
  0x13   : > { %s905_s9 = sadd.s32 1, %s804_s24   ;;  %s32_s10 = sadd.s32 1, %s800_s23 }
  0x14   : > { %p900_p11 = pnand %p582_p9, %p1103_p1  ;;  %s29_s11 = ssub.s32 %s804_s24, %s905_s9 }
  0x15   : > { %s1114_s2 = sld [smem:[#allocation15_spill]] }
  0x16   : > { %p644_p13 = pneg %p900_p11 }
  0x1b   : > { %s642_s14 = scalar_lea.hbm %s1114_s2, 256 }
  0x1c   : > { %p643_p12 = scmp.ne.s32.totalorder %s1114_s2, %s642_s14  ;;  %p649_p5 = scmp.lt.u32.totalorder %s642_s14, %s1114_s2 }
  0x1e   : > { %p645_p0 = pnand %p644_p13, %p643_p12 }
  0x20   : > { %p646_p3 = pneg %p645_p0 }
  0x22   : > { %p651_p7 = pnand %p649_p5, %p646_p3 }
  0x24   : > { %654 = shalt.err (!%p651_p7)
}
  0x25   : > { %s655_s19 = scalar_lea.vmem %s893_s7, 256  ;;  %p663_p2 = scmp.lt.s32.totalorder %s893_s7, %s893_s7 }
  0x26   : > { %p656_p9 = scmp.ne.s32.totalorder %s893_s7, %s655_s19  ;;  %p664_p6 = scmp.lt.s32.totalorder %s655_s19, %s655_s19 }
  0x28   : > { %p658_p10 = pnand %p656_p9, %p644_p13  ;;  %p665_p4 = por %p664_p6, %p663_p2 }
  0x2a   : > { %p659_p1 = pneg %p658_p10 }
  0x2c   : > { %p666_p8 = pnand %p665_p4, %p659_p1 }
  0x2e   : > { %669 = shalt.err (!%p666_p8)
}
  0x2f   : > { %s807_s20 = smov 64   ;;  %s808_s26 = smov 4  }
  0x30   : > { %585 = dma.hbm_to_vmem [thread:$0]  (!%p900_p11), %s1114_s2, 256, %s893_s7, [#allocation6], %s807_s20, %s807_s20, %s808_s26  }
  0x31   : > { %p30_p2 = scmp.eq.s32.totalorder %s29_s11, 0  ;;  %p39_p1 = scmp.ne.s32.totalorder %s800_s23, %s796_s22 }
  0x32   : > { %p40_p4 = scmp.eq.s32.totalorder %s804_s24, 0  ;;  %p598_p6 = scmp.lt.s32.totalorder %s804_s24, 2 }
  0x33   : > { %s936_s13 = scalar_select %p30_p2, %s800_s23, %s32_s10  }
  0x34   : > { %p41_p8 = por %p40_p4, %p39_p1  ;;  %p1116_p10 = scmp.eq.s32.totalorder %s870_s25, 1 }
  0x35   : > { %1115 = sst [smem:[#allocation14_spill]] %s936_s13  ;;  %s227_s15 = sand.u32 1, %s800_s23  }
  0x36   : > { %p940_p12 = por %p1116_p10, %p39_p1  ;;  %s543_s16 = sshll.u32 %s804_s24, 7 }
  0x37   : > { %s946_s17 = sshll.u32 %s227_s15, 3  ;;  %s951_s7 = scalar_lea.hbm %s1096_s0, %s543_s16 }
  0x38   : > { %s1117_s14 = scalar_select %p940_p12, 1, 0 }
  0x39   : > { %s231_s10 = scalar_lea.vmem [#allocation2], %s946_s17  ;;  %p954_p11 = pnand %p598_p6, %p41_p8 }
  0x3a   : > { %s238_s11 = sshll.u32 %s231_s10, 4  ;;  %s963_s30 = scalar_lea.hbm %s1097_s1, %s543_s16  ;;  %s958_s11 = int_to_ptr.vmem [resolvable:$true] %s238_s11 }
  0x3b   : > { %s228_s12 = scalar_lea.sflag [#allocation3], %s227_s15  ;;  %s670_s8 = scalar_lea.hbm %s951_s7, 128 }
  0x3c   : > { %p671_p13 = scmp.ne.s32.totalorder %s951_s7, %s670_s8  ;;  %p672_p0 = pneg %p954_p11 }
  0x3d   : > { %s675_s2 = scalar_lea.hbm %s1096_s0, 256  ;;  %p676_p7 = scmp.lt.u32.totalorder %s951_s7, %s1096_s0 }
  0x3e   : > { %p673_p3 = pnand %p672_p0, %p671_p13  ;;  %p677_p9 = scmp.lt.u32.totalorder %s675_s2, %s670_s8 }
  0x3f   : > { %p679_p1 = scmp.lt.u32.totalorder %s670_s8, %s951_s7 }
  0x40   : > { %p674_p5 = pneg %p673_p3  ;;  %p678_p2 = por %p677_p9, %p676_p7 }
  0x42   : > { %p680_p4 = por %p679_p1, %p678_p2 }
  0x44   : > { %p681_p6 = pnand %p680_p4, %p674_p5 }
  0x46   : > { %684 = shalt.err (!%p681_p6)
}
  0x47   : > { %s685_s15 = scalar_lea.vmem %s958_s11, 128  ;;  %s809_s16 = smov [#allocation2]  }
  0x48   : > { %p686_p8 = scmp.ne.s32.totalorder %s958_s11, %s685_s15  ;;  %s690_s20 = sshll.u32 %s809_s16, 4  ;;  %s691_s20 = int_to_ptr.vmem [resolvable:$false] %s690_s20 }
  0x49   : > { %s692_s23 = scalar_lea.vmem %s691_s20, 256  ;;  %p693_p3 = scmp.lt.s32.totalorder %s958_s11, %s691_s20 }
  0x4a   : > { %p688_p10 = pnand %p686_p8, %p672_p0  ;;  %p694_p7 = scmp.lt.s32.totalorder %s692_s23, %s685_s15 }
  0x4c   : > { %p689_p13 = pneg %p688_p10  ;;  %p695_p9 = por %p694_p7, %p693_p3 }
  0x4e   : > { %p696_p2 = pnand %p695_p9, %p689_p13 }
  0x50   : > { %699 = shalt.err (!%p696_p2)
}
  0x51   : > { %589 = dma.hbm_to_vmem [thread:$0]  (!%p954_p11), %s951_s7, 128, %s958_s11, %s228_s12  }
  0x52   : > { %s245_s2 = sand.u32 1, %s804_s24   ;;  %s249_s13 = scalar_lea.vmem [#allocation5], %s946_s17 }
  0x53   : > { %s256_s26 = sshll.u32 %s249_s13, 4  ;;  %s246_s8 = scalar_lea.sflag [#allocation6], %s245_s2  ;;  %s257_s26 = int_to_ptr.vmem [resolvable:$true] %s256_s26 }
  0x54   : > { %s700_s18 = scalar_lea.hbm %s963_s30, 128  ;;  %s705_s16 = scalar_lea.hbm %s1097_s1, 256 }
  0x55   : > { %p701_p5 = scmp.ne.s32.totalorder %s963_s30, %s700_s18  ;;  %p706_p6 = scmp.lt.u32.totalorder %s963_s30, %s1097_s1 }
  0x56   : > { %p707_p8 = scmp.lt.u32.totalorder %s705_s16, %s700_s18  ;;  %p709_p13 = scmp.lt.u32.totalorder %s700_s18, %s963_s30 }
  0x57   : > { %p703_p1 = pnand %p701_p5, %p672_p0 }
  0x58   : > { %p708_p10 = por %p707_p8, %p706_p6 }
  0x59   : > { %p704_p4 = pneg %p703_p1 }
  0x5a   : > { %p710_p3 = por %p709_p13, %p708_p10 }
  0x5c   : > { %p711_p7 = pnand %p710_p3, %p704_p4 }
  0x5e   : > { %714 = shalt.err (!%p711_p7)
}
  0x5f   : > { %s715_s17 = scalar_lea.vmem %s257_s26, 128  ;;  %s810_s7 = smov [#allocation5]  }
  0x60   : > { %p716_p9 = scmp.ne.s32.totalorder %s257_s26, %s715_s17  ;;  %s720_s11 = sshll.u32 %s810_s7, 4  ;;  %s721_s11 = int_to_ptr.vmem [resolvable:$false] %s720_s11 }
  0x61   : > { %s722_s12 = scalar_lea.vmem %s721_s11, 256  ;;  %p723_p1 = scmp.lt.s32.totalorder %s257_s26, %s721_s11 }
  0x62   : > { %p718_p2 = pnand %p716_p9, %p672_p0  ;;  %p724_p12 = scmp.lt.s32.totalorder %s722_s12, %s715_s17 }
  0x64   : > { %p719_p5 = pneg %p718_p2  ;;  %p725_p6 = por %p724_p12, %p723_p1 }
  0x66   : > { %p726_p8 = pnand %p725_p6, %p719_p5 }
  0x68   : > { %729 = shalt.err (!%p726_p8)
}
  0x69   : > { %592 = dma.hbm_to_vmem [thread:$0]  (!%p954_p11), %s963_s30, 128, %s257_s26, %s246_s8  }
  0x6a   : > { %p1119_p4 = scmp.ne.s32.totalorder %s1112_s29, 0 }
  0x6b   : > { %s1014_s2 = sand.u32 (!%p1119_p4), 1, %s796_s22   ;;  %p1120_p12 = scmp.ne.s32.totalorder (!%p1119_p4), %s1110_s27, 0 }
  0x6c   : > { %265 = sbr.rel (%p1119_p4) target bundleno = 674 (0x2a2), region = 44  ;;  %s1017_s13 = sshll.u32 (!%p1119_p4), %s1014_s2, 3 }
  0x6d   : > { %s268_s18 = scalar_lea.sflag (!%p1119_p4), [#allocation3], %s1014_s2  ;;  %s271_s10 = scalar_lea.vmem (!%p1119_p4), [#allocation2], %s1017_s13 }
  0x73   : > { %775 = dma.done.wait (%p1120_p12), %s268_s18, 128  }
  0x74   : > { %777 = vsyncadd (%p1120_p12), %s268_s18, 4294967168  ;;  %s276_s29 = sand.u32 1, %s870_s25   ;;  %s280_s30 = scalar_lea.vmem [#allocation5], %s1017_s13 }
  0x75   : > { %s277_s19 = scalar_lea.sflag [#allocation6], %s276_s29 }
  0x76   : > { %779 = dma.done.wait (%p1120_p12), %s277_s19, 128  }
  0x77   : > { %781 = vsyncadd (%p1120_p12), %s277_s19, 4294967168  ;;  %p1121_p11 = scmp.eq.s32.totalorder %s870_s25, 0 }
  0x79   : > { %783 = dma.done.wait (%p1121_p11), [#allocation6], 256   ;;  %p1122_p0 = pmov %p1121_p11 }
  0x7a   : > { %v811_v0 = vmov 0.0   ;;  %vm812_vm0 = vmmov 0   ;;  %v638_v1 = vld [vmem:[#allocation7] sm:$0xff]   ;;  %v639_v2 = vld [vmem:[#allocation7 + $0x8] sm:$0xff]   ;;  %vm344_vm1 = vcmask 261120   ;;  %v388_v7 = vld [vmem:[%s280_s30] sm:$0xff] }
  0x7b   : > { %785 = vsyncadd (%p1122_p0), [#allocation6], 4294967040  ;;  %564 = vmatprep.subr.bf16.mxu0 %v811_v0  ;;  %568 = vmatprep.mubr.msk.bf16.mxu0 %vm812_vm0, %v811_v0  ;;  %v319_v3 = vld [vmem:[%s271_s10] sm:$0xff]  ;;  %vm392_vm2 = vcmask 523264   ;;  %s558_s23 = sshll.u32 %s870_s25, 7  ;;  %s317_s17 = scalar_lea.vmem [#allocation8], %s1017_s13 }
  0x7c   : > { %565 = vmatpush3.bf16.msra.mxu0 %v638_v1  ;;  %v320_v4 = vpack.c.bf16 %v319_v3, %v319_v3  ;;  %v551_v5 = vld [vmem:[%s1099_s3] ss:$0 sm:$0xff]  ;;  %s436_s7 = sshll.u32 %s317_s17, 4  ;;  %s1051_s18 = scalar_lea.hbm %s1102_s6, %s558_s23  ;;  %s1053_s7 = int_to_ptr.vmem [resolvable:$true] %s436_s7 }
  0x7d   : > { %566 = vmatprep.subr.bf16.mxu0 %v811_v0  ;;  %v555_v23 = vld [vmem:[%s1100_s4] ss:$0 sm:$0xff]  ;;  %s423_s10 = scalar_lea.sflag [#allocation4], %s1014_s2  ;;  %s730_s29 = scalar_lea.vmem %s1053_s7, 128 }
  0x7e   : > { %v556_v25 = vld [vmem:[%s1101_s5] ss:$0 sm:$0xff]  ;;  %p731_p10 = scmp.ne.s32.totalorder %s1053_s7, %s730_s29  ;;  %p1123_p13 = scmp.ne.s32.totalorder %s1117_s14, 0 }
  0x7f   : > { %s813_s25 = smov [#allocation8]  }
  0x80   : > { %567 = vmatpush3.bf16.msra.mxu0 %v639_v2  ;;  %p732_p3 = pnand %p731_p10, %p1123_p13  ;;  %s734_s13 = sshll.u32 %s813_s25, 4  ;;  %s735_s13 = int_to_ptr.vmem [resolvable:$false] %s734_s13 }
  0x81   : > { %s736_s19 = scalar_lea.vmem %s735_s13, 256  ;;  %p737_p9 = scmp.lt.s32.totalorder %s1053_s7, %s735_s13 }
  0x82   : > { %p733_p7 = pneg %p732_p3  ;;  %p738_p2 = scmp.lt.s32.totalorder %s736_s19, %s730_s29 }
  0x83   : > { %569 = vmatmul.mubr.msk.bf16.vlgmr.msra.gmra.mrb[0].mxu0 %vm344_vm1, %v320_v4 }
  0x84   : > { %p739_p5 = por %p738_p2, %p737_p9 }
  0x86   : > { %p740_p1 = pnand %p739_p5, %p733_p7 }
 0x156   : > { %v382_v6 = vpop.f32.mrb[0].mxu0 }
 0x157   : > { %v383_v8 = vadd.f32 %v551_v5, %v382_v6  ;;  %v570_v9 = vpop.f32.mrb[1].mxu0 }
 0x158   : > { %v385_v10 = vpop.f32.mrb[2].mxu0 }
 0x159   : > { %v571_v11 = vpop.f32.mrb[3].mxu0  ;;  %v389_v12 = vadd.f32 %v388_v7, %v383_v8 }
 0x15b   : > { %v393_v13 = vsel %vm392_vm2, %v389_v12, 0.0 }
 0x15c   : > { %394 = vadd.xlane.f32.xlu0 %v393_v13 }
 0x1e9   : > { %v395_v14 = vpop.xlane.xlu0 %394 }
 0x1ea   : > { %v397_v15 = vmul.f32 0.015625, %v395_v14 }
 0x1ec   : > { %v398_v16 = vsub.f32 %v389_v12, %v397_v15 }
 0x1ee   : > { %v399_v17 = vmul.f32 %v398_v16, %v398_v16 }
 0x1f0   : > { %v400_v18 = vsel %vm392_vm2, %v399_v17, 0.0 }
 0x1f1   : > { %401 = vadd.xlane.f32.xlu0 %v400_v18 }
 0x27e   : > { %v402_v19 = vpop.xlane.xlu0 %401 }
 0x27f   : > { %v403_v20 = vmul.f32 0.015625, %v402_v19 }
 0x281   : > { %v404_v21 = vadd.f32 1e-05, %v403_v20 }
 0x283   : > { %640 = vrsqrt.f32 %v404_v21 }
 0x28d   : > { %v641_v22 = vpop.eup %640 }
 0x28e   : > { %v406_v24 = vmul.f32 %v641_v22, %v398_v16 }
 0x290   : > { %v413_v26 = vmul.f32 %v555_v23, %v406_v24 }
 0x292   : > { %v420_v27 = vadd.f32 %v556_v25, %v413_v26 }
 0x294   : > { %421 = vst.msk [vmem:[%s317_s17] sm:$0xff] %vm392_vm2, %v420_v27 }
 0x295   : > { %743 = shalt.err (!%p740_p1)
}
 0x296   : > { %s744_s2 = scalar_lea.hbm %s1051_s18, 128  ;;  %s748_s26 = scalar_lea.hbm %s1102_s6, 256 }
 0x297   : > { %p745_p6 = scmp.ne.s32.totalorder %s1051_s18, %s744_s2  ;;  %p749_p12 = scmp.lt.u32.totalorder %s1051_s18, %s1102_s6 }
 0x298   : > { %p750_p11 = scmp.lt.u32.totalorder %s748_s26, %s744_s2  ;;  %p752_p10 = scmp.lt.u32.totalorder %s744_s2, %s1051_s18 }
 0x299   : > { %p746_p8 = pnand %p745_p6, %p1123_p13 }
 0x29a   : > { %p751_p0 = por %p750_p11, %p749_p12 }
 0x29b   : > { %p747_p4 = pneg %p746_p8 }
 0x29c   : > { %p753_p3 = por %p752_p10, %p751_p0 }
 0x29e   : > { %p754_p7 = pnand %p753_p3, %p747_p4 }
 0x2a0   : > { %757 = shalt.err (!%p754_p7)
}
 0x2a1   : > { %580 = dma.vmem_to_hbm [thread:$0]  (%p1123_p13), %s1053_s7, 128, %s1051_s18, %s423_s10  }
 0x2a2 PF: > { %s448_s16 = sand.u32 1, %s792_s21   ;;  %p1124_p9 = scmp.ne.s32.totalorder %s1111_s28, 0 }
 0x2a3   : > { %p1125_p2 = scmp.ge.s32.totalorder %s804_s24, 2  ;;  %s449_s20 = scalar_lea.sflag [#allocation4], %s448_s16 }
 0x2a5   : > { %p594_p5 = pnand %p1125_p2, %p1124_p9 }
 0x2a7   : > { %787 = dma.done.wait (!%p594_p5), %s449_s20, 128  }
 0x2a8   : > { %789 = vsyncadd (!%p594_p5), %s449_s20, 4294967168  ;;  %s1126_s23 = sld [smem:[#allocation13_spill]]  ;;  %s1127_s17 = sld [smem:[#allocation14_spill]] }
 0x2a9   : > { %p22_p1 = scmp.ge.s32.totalorder %s905_s9, 4   ;;  %s1128_s21 = smov %s796_s22 }
 0x2aa   : > { %s1131_s24 = smov %s905_s9 }
 0x2ab   :  { %24 = sbr.rel (!%p22_p1) target bundleno = 9 (0x9), region = 106 }
 0x2ae   : > { %s1129_s22 = smov %s1126_s23  ;;  %s1130_s23 = smov %s1127_s17 }
 0x2b2   :  { %454 = vsyncpa [#allocation3], 1 }
 0x2b3   :  { %456 = vsyncpa [#allocation3 + $0x1], 1 }
 0x2b4   :  { %457 = vsyncpa [#allocation6], 1 }
 0x2b5   :  { %459 = vsyncpa [#allocation6 + $0x1], 1 }
 0x2b6   :  { %460 = vsyncpa [#allocation4], 1 }
 0x2b7   :  { %462 = vsyncpa [#allocation4 + $0x1], 1 }

</bundles_post_ra>
